<compile_context>
chip_gen: v5e
topology: v5e:2x2
jax: 0.10.0
libtpu: 0.0.40
codegen_flags: <defaults>
</compile_context>

<pallas_src>
import math

import jax
import jax.numpy as jnp
from jax.experimental import pallas as pl
from jax.experimental.pallas import tpu as pltpu


def _linear_kernel(x_ref, w_ref, b_ref, o_ref):
    """Row-tiled linear layer.

    x_ref: (row_tile, K)  VMEM tile of flattened ELMo representations
    w_ref: (K, O)         resident weight (pre-transposed to K-major)
    b_ref: (1, O)         resident bias (f32)
    o_ref: (row_tile, O)  lane-dense output tile
    """
    acc = jnp.dot(x_ref[...], w_ref[...], preferred_element_type=jnp.float32)
    o_ref[...] = (acc + b_ref[...]).astype(o_ref.dtype)


def elmo_rnn_head(h, weight, bias, *, row_tile=None):
    """Applies  linear(h).transpose(1, 2)  via a Pallas TPU kernel.

    h:      (B, T, K)  ELMo representations (f32 or bf16 from the producer)
    weight: (O, K)     nn.Linear weight (PyTorch layout)
    bias:   (O,)
    returns (B, O, T) in h.dtype
    """
    B, T, K = h.shape
    O = weight.shape[0]
    rows = B * T

    # Row-tile selection (review items 1-3):
    #  * rows <= 1024: one grid step -- per-step overhead (~0.35 us) dwarfs
    #    the handful of matmul bundles; no megacore benefit at this size.
    #  * rows  > 1024: 1024-row tiles -- best measured HBM streaming while
    #    keeping double-buffered x tiles (~8 MiB f32) well inside VMEM on all
    #    generations (v7x included), and giving >= 2 sizable tiles so both
    #    v7x TensorCores get balanced work.
    if row_tile is None:
        rows8 = ((rows + 7) // 8) * 8
        row_tile = rows8 if rows8 <= 1024 else 1024

    num_tiles = pl.cdiv(rows, row_tile)

    # No jnp.pad: Pallas handles the ragged last block (masked stores); the
    # extra rows read past the end never reach the output.
    x = h.reshape(rows, K)

    # One-time small-tensor prep in XLA: (K, O) weight matching x's dtype,
    # f32 bias (added to the f32 accumulator).
    w_kt = weight.astype(h.dtype).T
    bias2d = bias.astype(jnp.float32).reshape(1, O)

    itemsize = jnp.dtype(h.dtype).itemsize
    cost = pl.CostEstimate(
        flops=2 * rows * K * O,
        transcendentals=0,
        bytes_accessed=rows * K * itemsize + K * O * itemsize + rows * O * itemsize,
    )

    out_flat = pl.pallas_call(
        _linear_kernel,
        out_shape=jax.ShapeDtypeStruct((rows, O), h.dtype),
        grid_spec=pltpu.PrefetchScalarGridSpec(
            num_scalar_prefetch=0,
            grid=(num_tiles,),
            in_specs=[
                pl.BlockSpec((row_tile, K), lambda i: (i, 0)),  # row tile of x
                pl.BlockSpec((K, O), lambda i: (0, 0)),          # resident weight
                pl.BlockSpec((1, O), lambda i: (0, 0)),          # resident bias
            ],
            out_specs=pl.BlockSpec((row_tile, O), lambda i: (i, 0)),
        ),
        compiler_params=pltpu.CompilerParams(
            dimension_semantics=("parallel",),
        ),
        cost_estimate=cost,
    )(x, w_kt, bias2d)

    out = out_flat.reshape(B, T, O)
    return jnp.transpose(out, (0, 2, 1))   # (B, O, T) == PyTorch transpose(1, 2)


def _reference(h, weight, bias):
    # Pure-JAX reference of the PyTorch forward (post-ELMo part).
    out = jnp.einsum("btk,ok->bto", h, weight) + bias  # nn.Linear
    return jnp.transpose(out, (0, 2, 1))               # transpose(dim0=1, dim1=2)


if __name__ == "__main__":
    ELMO_HDIM = 1024   # fixed by the module (self.elmo_hdim)
    OUTPUT_DIM = 32
    B, T = 2, 8

    key = jax.random.PRNGKey(0)
    k_h, k_w, k_b = jax.random.split(key, 3)

    # Synthetic "elmo_representations[0]" tensor (stand-in for the ELMo encoder).
    h = jax.random.normal(k_h, (B, T, ELMO_HDIM), dtype=jnp.float32)

    # Deterministic nn.Linear-style init: U(-1/sqrt(in), 1/sqrt(in)).
    bound = 1.0 / math.sqrt(ELMO_HDIM)
    weight = jax.random.uniform(
        k_w, (OUTPUT_DIM, ELMO_HDIM), minval=-bound, maxval=bound, dtype=jnp.float32
    )
    bias = jax.random.uniform(
        k_b, (OUTPUT_DIM,), minval=-bound, maxval=bound, dtype=jnp.float32
    )

    out = elmo_rnn_head(h, weight, bias)
    out = jax.block_until_ready(out)

    ref = _reference(h, weight, bias)
    assert out.shape == (B, OUTPUT_DIM, T), out.shape
    assert jnp.allclose(out, ref, atol=1e-4, rtol=1e-4), "mismatch vs reference"

    print("KERNEL_OK")
</pallas_src>

<mosaic_0001>
module attributes {stable_mosaic.version = 11 : i64} {
  func.func @_linear_kernel(%arg0: i32, %arg1: memref<16x1024xf32, #tpu.memory_space<vmem>>, %arg2: memref<1024x32xf32, #tpu.memory_space<vmem>>, %arg3: memref<1x32xf32, #tpu.memory_space<vmem>>, %arg4: memref<16x32xf32, #tpu.memory_space<vmem>>) attributes {dimension_semantics = [#tpu.dimension_semantics<parallel>], iteration_bounds = array<i64: 1>, scalar_prefetch = 0 : i64, scratch_operands = 0 : i64, tpu.core_type = #tpu.core_type<tc>, window_params = [{transform_indices = @transform_0, window_bounds = array<i64: 16, 1024>}, {pipeline_mode = #tpu.pipeline_mode<synchronous>, transform_indices = @transform_1, window_bounds = array<i64: 1024, 32>}, {pipeline_mode = #tpu.pipeline_mode<synchronous>, transform_indices = @transform_2, window_bounds = array<i64: 1, 32>}, {transform_indices = @transform_3, window_bounds = array<i64: 16, 32>}]} {
    %c0 = arith.constant 0 : index
    %c0_0 = arith.constant 0 : index
    %0 = vector.load %arg1[%c0, %c0_0] : memref<16x1024xf32, #tpu.memory_space<vmem>>, vector<16x1024xf32>
    %c0_1 = arith.constant 0 : index
    %c0_2 = arith.constant 0 : index
    %1 = vector.load %arg2[%c0_1, %c0_2] : memref<1024x32xf32, #tpu.memory_space<vmem>>, vector<1024x32xf32>
    %cst = arith.constant dense<0.000000e+00> : vector<16x32xf32>
    %2 = tpu.matmul %0, %1, %cst {dimension_numbers = #tpu.dot_dimension_numbers<[1], [0], [0], [1], [0, 0, 1, 1], [], []>} : vector<16x1024xf32>, vector<1024x32xf32>, vector<16x32xf32> -> vector<16x32xf32>
    %c0_3 = arith.constant 0 : index
    %c0_4 = arith.constant 0 : index
    %3 = vector.load %arg3[%c0_3, %c0_4] : memref<1x32xf32, #tpu.memory_space<vmem>>, vector<1x32xf32>
    %4 = vector.broadcast %3 : vector<1x32xf32> to vector<16x32xf32>
    %5 = arith.addf %2, %4 : vector<16x32xf32>
    %c0_5 = arith.constant 0 : index
    %c0_6 = arith.constant 0 : index
    %6 = vector.load %arg4[%c0_5, %c0_6] : memref<16x32xf32, #tpu.memory_space<vmem>>, vector<16x32xf32>
    tpu.vector_store %arg4[%c0_5, %c0_6], %5 {strides = array<i32>} : memref<16x32xf32, #tpu.memory_space<vmem>>, vector<16x32xf32>,
    return
  }
  func.func @transform_0(%arg0: i32) -> (i32, i32) {
    %c0_i32 = arith.constant 0 : i32
    %c0_i32_0 = arith.constant 0 : i32
    return %arg0, %c0_i32 : i32, i32
  }
  func.func @transform_1(%arg0: i32) -> (i32, i32) {
    %c0_i32 = arith.constant 0 : i32
    %c0_i32_0 = arith.constant 0 : i32
    %c0_i32_1 = arith.constant 0 : i32
    return %c0_i32, %c0_i32_0 : i32, i32
  }
  func.func @transform_2(%arg0: i32) -> (i32, i32) {
    %c0_i32 = arith.constant 0 : i32
    %c0_i32_0 = arith.constant 0 : i32
    %c0_i32_1 = arith.constant 0 : i32
    return %c0_i32, %c0_i32_0 : i32, i32
  }
  func.func @transform_3(%arg0: i32) -> (i32, i32) {
    %c0_i32 = arith.constant 0 : i32
    %c0_i32_0 = arith.constant 0 : i32
    return %arg0, %c0_i32 : i32, i32
  }
}

</mosaic_0001>

<bundles_post_ra>
// kernel: tpu_custom_call.1
= control target key start
LH: loop header
LB: loop body
LE: loop exit
PB: predicated region body
PF: predicated region fallthrough
CT: control target
= control target key end

     0   :  { %s859_s0 = inlined_call_operand.vmem [shape: f32[16,1024], index: 0, kind: input, shape index: {}]   ;;  %s860_s1 = inlined_call_operand.vmem [shape: f32[1024,32], index: 1, kind: input, shape index: {}]   ;;  %s861_s2 = inlined_call_operand.vmem [shape: f32[1,32], index: 2, kind: input, shape index: {}]   ;;  %s862_s3 = inlined_call_operand.hbm [shape: f32[16,32], index: 3, kind: output, shape index: {}]  }
   0x1   :  { %v46_v0 = vld [vmem:[%s860_s1 + $0x78] sm:$0xff]  ;;  %v45_v2 = vld [vmem:[%s860_s1 + $0x70] sm:$0xff]  ;;  %v44_v6 = vld [vmem:[%s860_s1 + $0x68] sm:$0xff] }
   0x2   :  { %v78_v1 = vld [vmem:[%s860_s1 + $0x178] sm:$0xff]  ;;  %163 = vmatpush.msra.mxu0 %v46_v0  ;;  %v77_v4 = vld [vmem:[%s860_s1 + $0x170] sm:$0xff]  ;;  %v76_v8 = vld [vmem:[%s860_s1 + $0x168] sm:$0xff] }
   0x3   :  { %209 = vmatpush.msra.mxu2 %v78_v1  ;;  %v62_v3 = vld [vmem:[%s860_s1 + $0xf8] sm:$0xff]  ;;  %v61_v7 = vld [vmem:[%s860_s1 + $0xf0] sm:$0xff]  ;;  %v60_v10 = vld [vmem:[%s860_s1 + $0xe8] sm:$0xff] }
   0x4   :  { %v94_v5 = vld [vmem:[%s860_s1 + $0x1f8] sm:$0xff]  ;;  %186 = vmatpush.msra.mxu1 %v62_v3  ;;  %164 = vmatpush.msra.mxu0 %v45_v2  ;;  %v93_v9 = vld [vmem:[%s860_s1 + $0x1f0] sm:$0xff]  ;;  %v43_v11 = vld [vmem:[%s860_s1 + $0x60] sm:$0xff] }
   0x5   :  { %232 = vmatpush.msra.mxu3 %v94_v5  ;;  %210 = vmatpush.msra.mxu2 %v77_v4  ;;  %v75_v12 = vld [vmem:[%s860_s1 + $0x160] sm:$0xff]  ;;  %v92_v13 = vld [vmem:[%s860_s1 + $0x1e8] sm:$0xff]  ;;  %v42_v16 = vld [vmem:[%s860_s1 + $0x58] sm:$0xff] }
   0x6   :  { %187 = vmatpush.msra.mxu1 %v61_v7  ;;  %165 = vmatpush.msra.mxu0 %v44_v6  ;;  %v59_v14 = vld [vmem:[%s860_s1 + $0xe0] sm:$0xff]  ;;  %v74_v17 = vld [vmem:[%s860_s1 + $0x158] sm:$0xff]  ;;  %v41_v20 = vld [vmem:[%s860_s1 + $0x50] sm:$0xff] }
   0x7   :  { %233 = vmatpush.msra.mxu3 %v93_v9  ;;  %211 = vmatpush.msra.mxu2 %v76_v8  ;;  %v91_v15 = vld [vmem:[%s860_s1 + $0x1e0] sm:$0xff]  ;;  %v58_v18 = vld [vmem:[%s860_s1 + $0xd8] sm:$0xff]  ;;  %v73_v21 = vld [vmem:[%s860_s1 + $0x150] sm:$0xff] }
   0x8   :  { %188 = vmatpush.msra.mxu1 %v60_v10  ;;  %166 = vmatpush.msra.mxu0 %v43_v11  ;;  %v90_v19 = vld [vmem:[%s860_s1 + $0x1d8] sm:$0xff]  ;;  %v57_v22 = vld [vmem:[%s860_s1 + $0xd0] sm:$0xff]  ;;  %v40_v24 = vld [vmem:[%s860_s1 + $0x48] sm:$0xff] }
   0x9   :  { %234 = vmatpush.msra.mxu3 %v92_v13  ;;  %212 = vmatpush.msra.mxu2 %v75_v12  ;;  %v89_v23 = vld [vmem:[%s860_s1 + $0x1d0] sm:$0xff]  ;;  %v72_v25 = vld [vmem:[%s860_s1 + $0x148] sm:$0xff]  ;;  %v39_v28 = vld [vmem:[%s860_s1 + $0x40] sm:$0xff] }
   0xa   :  { %189 = vmatpush.msra.mxu1 %v59_v14  ;;  %167 = vmatpush.msra.mxu0 %v42_v16  ;;  %v56_v26 = vld [vmem:[%s860_s1 + $0xc8] sm:$0xff]  ;;  %v71_v29 = vld [vmem:[%s860_s1 + $0x140] sm:$0xff]  ;;  %v38_v32 = vld [vmem:[%s860_s1 + $0x38] sm:$0xff] }
   0xb   :  { %235 = vmatpush.msra.mxu3 %v91_v15  ;;  %213 = vmatpush.msra.mxu2 %v74_v17  ;;  %v88_v27 = vld [vmem:[%s860_s1 + $0x1c8] sm:$0xff]  ;;  %v55_v30 = vld [vmem:[%s860_s1 + $0xc0] sm:$0xff]  ;;  %v70_v33 = vld [vmem:[%s860_s1 + $0x138] sm:$0xff] }
   0xc   :  { %190 = vmatpush.msra.mxu1 %v58_v18  ;;  %168 = vmatpush.msra.mxu0 %v41_v20  ;;  %v87_v31 = vld [vmem:[%s860_s1 + $0x1c0] sm:$0xff]  ;;  %v54_v34 = vld [vmem:[%s860_s1 + $0xb8] sm:$0xff]  ;;  %v37_v36 = vld [vmem:[%s860_s1 + $0x30] sm:$0xff] }
   0xd   :  { %236 = vmatpush.msra.mxu3 %v90_v19  ;;  %214 = vmatpush.msra.mxu2 %v73_v21  ;;  %v86_v35 = vld [vmem:[%s860_s1 + $0x1b8] sm:$0xff]  ;;  %v69_v37 = vld [vmem:[%s860_s1 + $0x130] sm:$0xff]  ;;  %v36_v40 = vld [vmem:[%s860_s1 + $0x28] sm:$0xff] }
   0xe   :  { %191 = vmatpush.msra.mxu1 %v57_v22  ;;  %169 = vmatpush.msra.mxu0 %v40_v24  ;;  %v53_v38 = vld [vmem:[%s860_s1 + $0xb0] sm:$0xff]  ;;  %v68_v41 = vld [vmem:[%s860_s1 + $0x128] sm:$0xff]  ;;  %v35_v44 = vld [vmem:[%s860_s1 + $0x20] sm:$0xff] }
   0xf   :  { %237 = vmatpush.msra.mxu3 %v89_v23  ;;  %215 = vmatpush.msra.mxu2 %v72_v25  ;;  %v85_v39 = vld [vmem:[%s860_s1 + $0x1b0] sm:$0xff]  ;;  %v52_v42 = vld [vmem:[%s860_s1 + $0xa8] sm:$0xff]  ;;  %v67_v45 = vld [vmem:[%s860_s1 + $0x120] sm:$0xff] }
  0x10   :  { %192 = vmatpush.msra.mxu1 %v56_v26  ;;  %170 = vmatpush.msra.mxu0 %v39_v28  ;;  %v84_v43 = vld [vmem:[%s860_s1 + $0x1a8] sm:$0xff]  ;;  %v51_v46 = vld [vmem:[%s860_s1 + $0xa0] sm:$0xff]  ;;  %v34_v48 = vld [vmem:[%s860_s1 + $0x18] sm:$0xff] }
  0x11   :  { %238 = vmatpush.msra.mxu3 %v88_v27  ;;  %216 = vmatpush.msra.mxu2 %v71_v29  ;;  %v83_v47 = vld [vmem:[%s860_s1 + $0x1a0] sm:$0xff]  ;;  %v66_v49 = vld [vmem:[%s860_s1 + $0x118] sm:$0xff]  ;;  %v33_v52 = vld [vmem:[%s860_s1 + $0x10] sm:$0xff] }
  0x12   :  { %193 = vmatpush.msra.mxu1 %v55_v30  ;;  %171 = vmatpush.msra.mxu0 %v38_v32  ;;  %v50_v50 = vld [vmem:[%s860_s1 + $0x98] sm:$0xff]  ;;  %v65_v53 = vld [vmem:[%s860_s1 + $0x110] sm:$0xff]  ;;  %v32_v56 = vld [vmem:[%s860_s1 + $0x8] sm:$0xff] }
  0x13   :  { %239 = vmatpush.msra.mxu3 %v87_v31  ;;  %217 = vmatpush.msra.mxu2 %v70_v33  ;;  %v82_v51 = vld [vmem:[%s860_s1 + $0x198] sm:$0xff]  ;;  %v49_v54 = vld [vmem:[%s860_s1 + $0x90] sm:$0xff]  ;;  %v64_v57 = vld [vmem:[%s860_s1 + $0x108] sm:$0xff] }
  0x14   :  { %194 = vmatpush.msra.mxu1 %v54_v34  ;;  %172 = vmatpush.msra.mxu0 %v37_v36  ;;  %v81_v55 = vld [vmem:[%s860_s1 + $0x190] sm:$0xff]  ;;  %v48_v58 = vld [vmem:[%s860_s1 + $0x88] sm:$0xff]  ;;  %v31_v60 = vld [vmem:[%s860_s1] sm:$0xff] }
  0x15   :  { %240 = vmatpush.msra.mxu3 %v86_v35  ;;  %218 = vmatpush.msra.mxu2 %v69_v37  ;;  %v80_v59 = vld [vmem:[%s860_s1 + $0x188] sm:$0xff]  ;;  %v63_v61 = vld [vmem:[%s860_s1 + $0x100] sm:$0xff]  ;;  %v110_v62 = vld [vmem:[%s860_s1 + $0x278] sm:$0xff] }
  0x16   :  { %195 = vmatpush.msra.mxu1 %v53_v38  ;;  %173 = vmatpush.msra.mxu0 %v36_v40  ;;  %v142_v63 = vld [vmem:[%s860_s1 + $0x378] sm:$0xff]  ;;  %v47_v0 = vld [vmem:[%s860_s1 + $0x80] sm:$0xff]  ;;  %v109_v2 = vld [vmem:[%s860_s1 + $0x270] sm:$0xff] }
  0x17   :  { %241 = vmatpush.msra.mxu3 %v85_v39  ;;  %219 = vmatpush.msra.mxu2 %v68_v41  ;;  %v79_v1 = vld [vmem:[%s860_s1 + $0x180] sm:$0xff]  ;;  %v126_v3 = vld [vmem:[%s860_s1 + $0x2f8] sm:$0xff]  ;;  %v141_v4 = vld [vmem:[%s860_s1 + $0x370] sm:$0xff] }
  0x18   :  { %196 = vmatpush.msra.mxu1 %v52_v42  ;;  %174 = vmatpush.msra.mxu0 %v35_v44  ;;  %v158_v5 = vld [vmem:[%s860_s1 + $0x3f8] sm:$0xff]  ;;  %v108_v6 = vld [vmem:[%s860_s1 + $0x268] sm:$0xff]  ;;  %v125_v7 = vld [vmem:[%s860_s1 + $0x2f0] sm:$0xff] }
  0x19   :  { %242 = vmatpush.msra.mxu3 %v84_v43  ;;  %220 = vmatpush.msra.mxu2 %v67_v45  ;;  %v140_v8 = vld [vmem:[%s860_s1 + $0x368] sm:$0xff]  ;;  %v157_v9 = vld [vmem:[%s860_s1 + $0x3f0] sm:$0xff]  ;;  %v107_v10 = vld [vmem:[%s860_s1 + $0x260] sm:$0xff] }
  0x1a   :  { %197 = vmatpush.msra.mxu1 %v51_v46  ;;  %175 = vmatpush.msra.mxu0 %v34_v48  ;;  %v124_v11 = vld [vmem:[%s860_s1 + $0x2e8] sm:$0xff]  ;;  %v139_v12 = vld [vmem:[%s860_s1 + $0x360] sm:$0xff]  ;;  %v106_v14 = vld [vmem:[%s860_s1 + $0x258] sm:$0xff] }
  0x1b   :  { %243 = vmatpush.msra.mxu3 %v83_v47  ;;  %221 = vmatpush.msra.mxu2 %v66_v49  ;;  %v156_v13 = vld [vmem:[%s860_s1 + $0x3e8] sm:$0xff]  ;;  %v123_v15 = vld [vmem:[%s860_s1 + $0x2e0] sm:$0xff]  ;;  %v138_v16 = vld [vmem:[%s860_s1 + $0x358] sm:$0xff] }
  0x1c   :  { %198 = vmatpush.msra.mxu1 %v50_v50  ;;  %176 = vmatpush.msra.mxu0 %v33_v52  ;;  %v155_v17 = vld [vmem:[%s860_s1 + $0x3e0] sm:$0xff]  ;;  %v105_v18 = vld [vmem:[%s860_s1 + $0x250] sm:$0xff]  ;;  %v122_v19 = vld [vmem:[%s860_s1 + $0x2d8] sm:$0xff] }
  0x1d   :  { %244 = vmatpush.msra.mxu3 %v82_v51  ;;  %222 = vmatpush.msra.mxu2 %v65_v53  ;;  %v137_v20 = vld [vmem:[%s860_s1 + $0x350] sm:$0xff]  ;;  %v154_v21 = vld [vmem:[%s860_s1 + $0x3d8] sm:$0xff]  ;;  %v104_v22 = vld [vmem:[%s860_s1 + $0x248] sm:$0xff] }
  0x1e   :  { %199 = vmatpush.msra.mxu1 %v49_v54  ;;  %177 = vmatpush.msra.mxu0 %v32_v56  ;;  %v121_v23 = vld [vmem:[%s860_s1 + $0x2d0] sm:$0xff]  ;;  %v136_v24 = vld [vmem:[%s860_s1 + $0x348] sm:$0xff]  ;;  %v103_v26 = vld [vmem:[%s860_s1 + $0x240] sm:$0xff] }
  0x1f   :  { %245 = vmatpush.msra.mxu3 %v81_v55  ;;  %223 = vmatpush.msra.mxu2 %v64_v57  ;;  %v153_v25 = vld [vmem:[%s860_s1 + $0x3d0] sm:$0xff]  ;;  %v120_v27 = vld [vmem:[%s860_s1 + $0x2c8] sm:$0xff]  ;;  %v135_v28 = vld [vmem:[%s860_s1 + $0x340] sm:$0xff] }
  0x20   :  { %200 = vmatpush.msra.mxu1 %v48_v58  ;;  %178 = vmatpush.msra.mxu0 %v31_v60  ;;  %v152_v29 = vld [vmem:[%s860_s1 + $0x3c8] sm:$0xff]  ;;  %v15_v30 = vld [vmem:[%s859_s0] sm:$0xff]  ;;  %v17_v31 = vld [vmem:[%s859_s0 + $0x10] sm:$0xff] }
  0x21   :  { %246 = vmatpush.msra.mxu3 %v80_v59  ;;  %224 = vmatpush.msra.mxu2 %v63_v61  ;;  %v102_v32 = vld [vmem:[%s860_s1 + $0x238] sm:$0xff]  ;;  %v119_v33 = vld [vmem:[%s860_s1 + $0x2c0] sm:$0xff]  ;;  %v16_v36 = vld [vmem:[%s859_s0 + $0x8] sm:$0xff] }
  0x22   :  { %255 = vmatpush.msrb.mxu0 %v110_v62  ;;  %201 = vmatpush.msra.mxu1 %v47_v0  ;;  %v134_v34 = vld [vmem:[%s860_s1 + $0x338] sm:$0xff]  ;;  %v151_v35 = vld [vmem:[%s860_s1 + $0x3c0] sm:$0xff] }
  0x23   :  { %301 = vmatpush.msrb.mxu2 %v142_v63  ;;  %247 = vmatpush.msra.mxu3 %v79_v1  ;;  %v18_v37 = vld [vmem:[%s859_s0 + $0x18] sm:$0xff] }
  0x24   :  { %256 = vmatpush.msrb.mxu0 %v109_v2  ;;  %278 = vmatpush.msrb.mxu1 %v126_v3 }
  0x25   :  { %302 = vmatpush.msrb.mxu2 %v141_v4  ;;  %324 = vmatpush.msrb.mxu3 %v158_v5 }
  0x26   :  { %257 = vmatpush.msrb.mxu0 %v108_v6  ;;  %279 = vmatpush.msrb.mxu1 %v125_v7 }
  0x27   :  { %303 = vmatpush.msrb.mxu2 %v140_v8  ;;  %325 = vmatpush.msrb.mxu3 %v157_v9 }
  0x28   :  { %258 = vmatpush.msrb.mxu0 %v107_v10  ;;  %280 = vmatpush.msrb.mxu1 %v124_v11 }
  0x29   :  { %304 = vmatpush.msrb.mxu2 %v139_v12  ;;  %326 = vmatpush.msrb.mxu3 %v156_v13 }
  0x2a   :  { %259 = vmatpush.msrb.mxu0 %v106_v14  ;;  %281 = vmatpush.msrb.mxu1 %v123_v15 }
  0x2b   :  { %305 = vmatpush.msrb.mxu2 %v138_v16  ;;  %327 = vmatpush.msrb.mxu3 %v155_v17 }
  0x2c   :  { %260 = vmatpush.msrb.mxu0 %v105_v18  ;;  %282 = vmatpush.msrb.mxu1 %v122_v19 }
  0x2d   :  { %306 = vmatpush.msrb.mxu2 %v137_v20  ;;  %328 = vmatpush.msrb.mxu3 %v154_v21 }
  0x2e   :  { %261 = vmatpush.msrb.mxu0 %v104_v22  ;;  %283 = vmatpush.msrb.mxu1 %v121_v23 }
  0x2f   :  { %307 = vmatpush.msrb.mxu2 %v136_v24  ;;  %329 = vmatpush.msrb.mxu3 %v153_v25 }
  0x30   :  { %262 = vmatpush.msrb.mxu0 %v103_v26  ;;  %284 = vmatpush.msrb.mxu1 %v120_v27 }
  0x31   :  { %308 = vmatpush.msrb.mxu2 %v135_v28  ;;  %330 = vmatpush.msrb.mxu3 %v152_v29 }
  0x32   :  { %179 = vmatmul.f32.vlgmr.msra.gmra.mxu0 %v15_v30  ;;  %225 = vmatmul.f32.vlgmr.msra.gmra.mxu2 %v17_v31 }
  0x33   :  { %8 = vsyncpa [#allocation3], 0  ;;  %263 = vmatpush.msrb.mxu0 %v102_v32  ;;  %285 = vmatpush.msrb.mxu1 %v119_v33  ;;  %v101_v38 = vld [vmem:[%s860_s1 + $0x230] sm:$0xff]  ;;  %v118_v39 = vld [vmem:[%s860_s1 + $0x2b8] sm:$0xff]  ;;  %vm347_vm0 = vcmask 261120   ;;  %s356_s6 = sshll.u32 %s862_s3, 4  ;;  %s357_s6 = int_to_ptr.hbm [resolvable:$true] %s356_s6 }
  0x34   :  { %309 = vmatpush.msrb.mxu2 %v134_v34  ;;  %331 = vmatpush.msrb.mxu3 %v151_v35  ;;  %v133_v40 = vld [vmem:[%s860_s1 + $0x330] sm:$0xff]  ;;  %v150_v41 = vld [vmem:[%s860_s1 + $0x3b8] sm:$0xff]  ;;  %v100_v42 = vld [vmem:[%s860_s1 + $0x228] sm:$0xff]  ;;  %s399_s7 = smov 128   ;;  %s400_s8 = smov 8  }
  0x35   :  { %202 = vmatmul.f32.vlgmr.msra.gmra.mxu1 %v16_v36  ;;  %248 = vmatmul.f32.vlgmr.msra.gmra.mxu3 %v18_v37  ;;  %v117_v43 = vld [vmem:[%s860_s1 + $0x2b0] sm:$0xff]  ;;  %v132_v44 = vld [vmem:[%s860_s1 + $0x328] sm:$0xff]  ;;  %v99_v46 = vld [vmem:[%s860_s1 + $0x220] sm:$0xff] }
  0x36   :  { %264 = vmatpush.msrb.mxu0 %v101_v38  ;;  %286 = vmatpush.msrb.mxu1 %v118_v39  ;;  %v149_v45 = vld [vmem:[%s860_s1 + $0x3b0] sm:$0xff]  ;;  %v116_v47 = vld [vmem:[%s860_s1 + $0x2a8] sm:$0xff]  ;;  %v131_v48 = vld [vmem:[%s860_s1 + $0x320] sm:$0xff] }
  0x37   :  { %310 = vmatpush.msrb.mxu2 %v133_v40  ;;  %332 = vmatpush.msrb.mxu3 %v150_v41  ;;  %v148_v49 = vld [vmem:[%s860_s1 + $0x3a8] sm:$0xff]  ;;  %v23_v50 = vld [vmem:[%s859_s0 + $0x40] sm:$0xff]  ;;  %v25_v51 = vld [vmem:[%s859_s0 + $0x50] sm:$0xff] }
  0x38   :  { %265 = vmatpush.msrb.mxu0 %v100_v42  ;;  %287 = vmatpush.msrb.mxu1 %v117_v43  ;;  %v98_v52 = vld [vmem:[%s860_s1 + $0x218] sm:$0xff]  ;;  %v115_v53 = vld [vmem:[%s860_s1 + $0x2a0] sm:$0xff]  ;;  %v24_v56 = vld [vmem:[%s859_s0 + $0x48] sm:$0xff] }
  0x39   :  { %311 = vmatpush.msrb.mxu2 %v132_v44  ;;  %333 = vmatpush.msrb.mxu3 %v149_v45  ;;  %v130_v54 = vld [vmem:[%s860_s1 + $0x318] sm:$0xff]  ;;  %v147_v55 = vld [vmem:[%s860_s1 + $0x3a0] sm:$0xff]  ;;  %v97_v58 = vld [vmem:[%s860_s1 + $0x210] sm:$0xff] }
  0x3a   :  { %266 = vmatpush.msrb.mxu0 %v99_v46  ;;  %288 = vmatpush.msrb.mxu1 %v116_v47  ;;  %v26_v57 = vld [vmem:[%s859_s0 + $0x58] sm:$0xff]  ;;  %v129_v60 = vld [vmem:[%s860_s1 + $0x310] sm:$0xff]  ;;  %v96_v62 = vld [vmem:[%s860_s1 + $0x208] sm:$0xff] }
  0x3b   :  { %312 = vmatpush.msrb.mxu2 %v131_v48  ;;  %334 = vmatpush.msrb.mxu3 %v148_v49  ;;  %v114_v59 = vld [vmem:[%s860_s1 + $0x298] sm:$0xff]  ;;  %v113_v63 = vld [vmem:[%s860_s1 + $0x290] sm:$0xff]  ;;  %v128_v0 = vld [vmem:[%s860_s1 + $0x308] sm:$0xff] }
  0x3c   :  { %182 = vmatmul.f32.gmra.mxu0 %v23_v50  ;;  %228 = vmatmul.f32.gmra.mxu2 %v25_v51  ;;  %v146_v61 = vld [vmem:[%s860_s1 + $0x398] sm:$0xff]  ;;  %v145_v1 = vld [vmem:[%s860_s1 + $0x390] sm:$0xff]  ;;  %v95_v2 = vld [vmem:[%s860_s1 + $0x200] sm:$0xff] }
  0x3d   :  { %267 = vmatpush.msrb.mxu0 %v98_v52  ;;  %289 = vmatpush.msrb.mxu1 %v115_v53  ;;  %v112_v3 = vld [vmem:[%s860_s1 + $0x288] sm:$0xff]  ;;  %v127_v4 = vld [vmem:[%s860_s1 + $0x300] sm:$0xff]  ;;  %v21_v7 = vld [vmem:[%s859_s0 + $0x30] sm:$0xff] }
  0x3e   :  { %313 = vmatpush.msrb.mxu2 %v130_v54  ;;  %335 = vmatpush.msrb.mxu3 %v147_v55  ;;  %v144_v5 = vld [vmem:[%s860_s1 + $0x388] sm:$0xff]  ;;  %v19_v6 = vld [vmem:[%s859_s0 + $0x20] sm:$0xff]  ;;  %v22_v11 = vld [vmem:[%s859_s0 + $0x38] sm:$0xff] }
  0x3f   :  { %205 = vmatmul.f32.gmra.mxu1 %v24_v56  ;;  %251 = vmatmul.f32.gmra.mxu3 %v26_v57  ;;  %v111_v8 = vld [vmem:[%s860_s1 + $0x280] sm:$0xff]  ;;  %v20_v10 = vld [vmem:[%s859_s0 + $0x28] sm:$0xff]  ;;  %v29_v13 = vld [vmem:[%s859_s0 + $0x70] sm:$0xff] }
  0x40   :  { %268 = vmatpush.msrb.mxu0 %v97_v58  ;;  %290 = vmatpush.msrb.mxu1 %v114_v59  ;;  %v143_v9 = vld [vmem:[%s860_s1 + $0x380] sm:$0xff]  ;;  %v28_v14 = vld [vmem:[%s859_s0 + $0x68] sm:$0xff]  ;;  %v30_v15 = vld [vmem:[%s859_s0 + $0x78] sm:$0xff] }
  0x41   :  { %314 = vmatpush.msrb.mxu2 %v129_v60  ;;  %336 = vmatpush.msrb.mxu3 %v146_v61  ;;  %v27_v12 = vld [vmem:[%s859_s0 + $0x60] sm:$0xff]  ;;  %s398_s0 = smov [#allocation2]  }
  0x42   :  { %269 = vmatpush.msrb.mxu0 %v96_v62  ;;  %291 = vmatpush.msrb.mxu1 %v113_v63  ;;  %v371_v17 = vld [vmem:[%s861_s2] ss:$0 sm:$0xff]  ;;  %s354_s2 = sshll.u32 %s398_s0, 4  ;;  %s355_s2 = int_to_ptr.vmem [resolvable:$true] %s354_s2 }
  0x43   :  { %315 = vmatpush.msrb.mxu2 %v128_v0  ;;  %337 = vmatpush.msrb.mxu3 %v145_v1 }
  0x44   :  { %270 = vmatpush.msrb.mxu0 %v95_v2  ;;  %292 = vmatpush.msrb.mxu1 %v112_v3 }
  0x45   :  { %316 = vmatpush.msrb.mxu2 %v127_v4  ;;  %338 = vmatpush.msrb.mxu3 %v144_v5 }
  0x46   :  { %271 = vmatmul.f32.vlgmr.msrb.gmra.mxu0 %v19_v6  ;;  %317 = vmatmul.f32.vlgmr.msrb.gmra.mxu2 %v21_v7 }
  0x47   :  { %293 = vmatpush.msrb.mxu1 %v111_v8  ;;  %339 = vmatpush.msrb.mxu3 %v143_v9 }
  0x48   :  { %294 = vmatmul.f32.vlgmr.msrb.gmra.mxu1 %v20_v10  ;;  %340 = vmatmul.f32.vlgmr.msrb.gmra.mxu3 %v22_v11 }
  0x4e   :  { %274 = vmatmul.f32.gmra.mxu0 %v27_v12  ;;  %320 = vmatmul.f32.gmra.mxu2 %v29_v13 }
  0x50   :  { %297 = vmatmul.f32.gmra.mxu1 %v28_v14  ;;  %343 = vmatmul.f32.gmra.mxu3 %v30_v15 }
  0xaf   :  { %v180_v16 = vpop.f32.mrf.mxu0 }
  0xb0   :  { %v181_v20 = vadd.f32 %v371_v17, %v180_v16 }
  0xb2   :  { %v203_v18 = vpop.f32.mrf.mxu1 }
  0xb3   :  { %v204_v23 = vadd.f32 %v203_v18, %v181_v20 }
  0xb5   :  { %v226_v19 = vpop.f32.mrf.mxu2 }
  0xb6   :  { %v227_v25 = vadd.f32 %v226_v19, %v204_v23 }
  0xb8   :  { %v249_v21 = vpop.f32.mrf.mxu3 }
  0xb9   :  { %v183_v22 = vpop.f32.mrf.mxu0  ;;  %v250_v28 = vadd.f32 %v249_v21, %v227_v25 }
  0xba   :  { %v184_v26 = vadd.f32 %v371_v17, %v183_v22 }
  0xbc   :  { %v206_v24 = vpop.f32.mrf.mxu1 }
  0xbd   :  { %v207_v29 = vadd.f32 %v206_v24, %v184_v26 }
  0xbf   :  { %v229_v27 = vpop.f32.mrf.mxu2 }
  0xc0   :  { %v230_v34 = vadd.f32 %v229_v27, %v207_v29 }
  0xc2   :  { %v252_v30 = vpop.f32.mrf.mxu3 }
  0xc3   :  { %v272_v31 = vpop.f32.mrf.mxu0  ;;  %v253_v37 = vadd.f32 %v252_v30, %v230_v34 }
  0xc4   :  { %v273_v32 = vadd.f32 %v272_v31, %v250_v28 }
  0xc5   :  { %v295_v33 = vpop.f32.mrf.mxu1 }
  0xc6   :  { %v296_v35 = vadd.f32 %v295_v33, %v273_v32 }
  0xc9   :  { %v318_v36 = vpop.f32.mrf.mxu2 }
  0xca   :  { %v319_v38 = vadd.f32 %v318_v36, %v296_v35 }
  0xcb   :  { %v275_v39 = vpop.f32.mrf.mxu0  ;;  %v341_v40 = vpop.f32.mrf.mxu3 }
  0xcc   :  { %v276_v41 = vadd.f32 %v275_v39, %v253_v37  ;;  %v342_v42 = vadd.f32 %v341_v40, %v319_v38 }
  0xcd   :  { %v298_v43 = vpop.f32.mrf.mxu1 }
  0xce   :  { %348 = vst.msk [vmem:[#allocation2] sm:$0xff] %vm347_vm0, %v342_v42  ;;  %v299_v44 = vadd.f32 %v298_v43, %v276_v41 }
  0xd1   :  { %v321_v45 = vpop.f32.mrf.mxu2 }
  0xd2   :  { %v322_v46 = vadd.f32 %v321_v45, %v299_v44 }
  0xd3   :  { %v344_v47 = vpop.f32.mrf.mxu3 }
  0xd4   :  { %v345_v48 = vadd.f32 %v344_v47, %v322_v46 }
  0xd6   :  { %349 = vst.msk [vmem:[#allocation2 + $0x8] sm:$0xff] %vm347_vm0, %v345_v48 }
  0xd7   :  { %362 = dma.vmem_to_hbm [thread:$0]  %s355_s2, 256, %s357_s6, [#allocation3], %s399_s7, %s399_s7, %s400_s8  }
  0xd8   :  { %396 = dma.done.wait [#allocation3], 256  }
  0xd9   :  { %397 = vsyncadd [#allocation3], 4294967040 }
  0xda   :  { %367 = vsyncpa [#allocation3], 1 }

</bundles_post_ra>
